<compile_context>
chip_gen: v5e
topology: v5e:2x2
jax: 0.10.0
libtpu: 0.0.40
codegen_flags: <defaults>
</compile_context>

<pallas_src>
import functools

import jax
import jax.numpy as jnp
from jax.experimental import pallas as pl
from jax.experimental.pallas import tpu as pltpu

LANE = 128


def _round_up(n, m):
    return ((n + m - 1) // m) * m


def _qnet_kernel(x_ref, w1_ref, b1_ref, w2_ref, b2_ref, w3_ref, b3_ref, out_ref,
                 *, n_actions):
    # x: (tb, obs) f32.  Weights: bf16, lane-padded.  Biases: f32.
    # out: (tb, n_actions) f32 — narrow, so only real action values hit HBM.
    x = x_ref[...].astype(jnp.bfloat16)

    # Layer 1: Linear(obs, 64->128 padded) + ReLU   (padded lanes stay exactly 0)
    h1 = jnp.dot(x, w1_ref[...], preferred_element_type=jnp.float32) + b1_ref[...]
    h1 = jnp.maximum(h1, 0.0).astype(jnp.bfloat16)

    # Layer 2: Linear(128, 128) + ReLU
    h2 = jnp.dot(h1, w2_ref[...], preferred_element_type=jnp.float32) + b2_ref[...]
    h2 = jnp.maximum(h2, 0.0).astype(jnp.bfloat16)

    # Layer 3: Linear(128, n_actions) — matmul on the padded weight, store narrow.
    out = jnp.dot(h2, w3_ref[...], preferred_element_type=jnp.float32)
    out_ref[...] = (out[:, :n_actions] + b3_ref[...]).astype(out_ref.dtype)


@functools.partial(jax.jit, static_argnames=("tile_batch",))
def qnetwork_forward(x, params, *, tile_batch=2048):
    """x: [batch, obs_size] float32. params: dict of w1,b1,w2,b2,w3,b3 (unpadded)."""
    w1, b1 = params["w1"], params["b1"]
    w2, b2 = params["w2"], params["b2"]
    w3, b3 = params["w3"], params["b3"]

    batch, obs = x.shape
    hidden = w1.shape[1]
    n_actions = w3.shape[1]

    # ---- Lane padding (hidden dim and w3's output dim up to 128, matmul-only) -----
    hp = _round_up(hidden, LANE)
    ap = _round_up(n_actions, LANE)

    f32, bf16 = jnp.float32, jnp.bfloat16
    w1p = jnp.zeros((obs, hp), f32).at[:, :hidden].set(w1.astype(f32)).astype(bf16)
    b1p = jnp.zeros((1, hp), f32).at[:, :hidden].set(b1.reshape(1, -1).astype(f32))
    w2p = jnp.zeros((hp, hp), f32).at[:hidden, :hidden].set(w2.astype(f32)).astype(bf16)
    b2p = jnp.zeros((1, hp), f32).at[:, :hidden].set(b2.reshape(1, -1).astype(f32))
    w3p = (jnp.zeros((hp, ap), f32)
           .at[:hidden, :n_actions].set(w3.astype(f32)).astype(bf16))
    b3r = b3.reshape(1, -1).astype(f32)

    # ---- Batch tiling --------------------------------------------------------------
    # Large tiles amortize per-grid-step overhead; if the batch fits in one tile,
    # split it in two so the 'parallel' axis can shard across both TCs on v7x.
    tb = min(tile_batch, _round_up(batch, 8))
    batch_p = _round_up(batch, tb)
    if batch_p // tb == 1 and batch_p >= 16:
        tb = _round_up(batch_p // 2, 8)
        batch_p = _round_up(batch, tb)

    x = x.astype(f32)
    if batch_p != batch:
        x = jnp.pad(x, ((0, batch_p - batch), (0, 0)))

    grid = (batch_p // tb,)
    kernel = functools.partial(_qnet_kernel, n_actions=n_actions)

    out = pl.pallas_call(
        kernel,
        out_shape=jax.ShapeDtypeStruct((batch_p, n_actions), f32),
        grid=grid,
        in_specs=[
            pl.BlockSpec((tb, obs), lambda i: (i, 0)),       # x: tiled over batch
            pl.BlockSpec((obs, hp), lambda i: (0, 0)),       # weights/biases resident
            pl.BlockSpec((1, hp), lambda i: (0, 0)),
            pl.BlockSpec((hp, hp), lambda i: (0, 0)),
            pl.BlockSpec((1, hp), lambda i: (0, 0)),
            pl.BlockSpec((hp, ap), lambda i: (0, 0)),
            pl.BlockSpec((1, n_actions), lambda i: (0, 0)),
        ],
        out_specs=pl.BlockSpec((tb, n_actions), lambda i: (i, 0)),
        compiler_params=pltpu.CompilerParams(
            dimension_semantics=("parallel",),
        ),
    )(x, w1p, b1p, w2p, b2p, w3p, b3r)

    # Strip only the batch padding (action dim is already exact).
    return out[:batch]


def init_params(key, obs_size, n_actions, hidden=64):
    """Deterministic synthetic init (Kaiming-uniform-ish like PyTorch default)."""
    ks = jax.random.split(key, 6)

    def linear(kw, kb, fan_in, fan_out):
        bound = 1.0 / jnp.sqrt(fan_in)
        w = jax.random.uniform(kw, (fan_in, fan_out), jnp.float32, -bound, bound)
        b = jax.random.uniform(kb, (fan_out,), jnp.float32, -bound, bound)
        return w, b

    w1, b1 = linear(ks[0], ks[1], obs_size, hidden)
    w2, b2 = linear(ks[2], ks[3], hidden, hidden)
    w3, b3 = linear(ks[4], ks[5], hidden, n_actions)
    return {"w1": w1, "b1": b1, "w2": w2, "b2": b2, "w3": w3, "b3": b3}


def _reference_bf16(x, p):
    """Matches the kernel's numerics: bf16 matmul inputs, f32 accumulation/bias/ReLU."""
    bf16 = jnp.bfloat16
    h1 = jnp.dot(x.astype(bf16), p["w1"].astype(bf16),
                 preferred_element_type=jnp.float32) + p["b1"]
    h1 = jnp.maximum(h1, 0.0)
    h2 = jnp.dot(h1.astype(bf16), p["w2"].astype(bf16),
                 preferred_element_type=jnp.float32) + p["b2"]
    h2 = jnp.maximum(h2, 0.0)
    return jnp.dot(h2.astype(bf16), p["w3"].astype(bf16),
                   preferred_element_type=jnp.float32) + p["b3"]


def _reference_f32(x, p):
    h1 = jnp.maximum(x @ p["w1"] + p["b1"], 0.0)
    h2 = jnp.maximum(h1 @ p["w2"] + p["b2"], 0.0)
    return h2 @ p["w3"] + p["b3"]


if __name__ == "__main__":
    key = jax.random.PRNGKey(0)
    k_x, k_x2, k_p = jax.random.split(key, 3)

    batch, obs_size, n_actions = 8, 4, 2  # CartPole-like dims
    params = init_params(k_p, obs_size, n_actions)

    # Small per-step batch.
    x = jax.random.normal(k_x, (batch, obs_size), jnp.float32)
    out = jax.block_until_ready(qnetwork_forward(x, params))
    assert out.shape == (batch, n_actions)
    assert jnp.allclose(out, _reference_bf16(x, params), atol=5e-3, rtol=5e-3)
    assert jnp.allclose(out, _reference_f32(x, params), atol=5e-2, rtol=5e-2)

    # Batch not divisible by 8 / tile size (exercises padding + 2-step grid path).
    x2 = jax.random.normal(k_x2, (37, obs_size), jnp.float32)
    out2 = jax.block_until_ready(qnetwork_forward(x2, params))
    assert out2.shape == (37, n_actions)
    assert jnp.allclose(out2, _reference_bf16(x2, params), atol=5e-3, rtol=5e-3)
    assert jnp.allclose(out2, _reference_f32(x2, params), atol=5e-2, rtol=5e-2)

    print("KERNEL_OK")
</pallas_src>

<mosaic_0001>
module attributes {stable_mosaic.version = 11 : i64} {
  func.func @_qnet_kernel(%arg0: i32, %arg1: memref<8x4xf32, #tpu.memory_space<vmem>>, %arg2: memref<4x128xbf16, #tpu.memory_space<vmem>>, %arg3: memref<1x128xf32, #tpu.memory_space<vmem>>, %arg4: memref<128x128xbf16, #tpu.memory_space<vmem>>, %arg5: memref<1x128xf32, #tpu.memory_space<vmem>>, %arg6: memref<128x128xbf16, #tpu.memory_space<vmem>>, %arg7: memref<1x2xf32, #tpu.memory_space<vmem>>, %arg8: memref<8x2xf32, #tpu.memory_space<vmem>>) attributes {dimension_semantics = [#tpu.dimension_semantics<parallel>], iteration_bounds = array<i64: 1>, scalar_prefetch = 0 : i64, scratch_operands = 0 : i64, tpu.core_type = #tpu.core_type<tc>, window_params = [{transform_indices = @transform_0, window_bounds = array<i64: 8, 4>}, {pipeline_mode = #tpu.pipeline_mode<synchronous>, transform_indices = @transform_1, window_bounds = array<i64: 4, 128>}, {pipeline_mode = #tpu.pipeline_mode<synchronous>, transform_indices = @transform_2, window_bounds = array<i64: 1, 128>}, {pipeline_mode = #tpu.pipeline_mode<synchronous>, transform_indices = @transform_3, window_bounds = array<i64: 128, 128>}, {pipeline_mode = #tpu.pipeline_mode<synchronous>, transform_indices = @transform_4, window_bounds = array<i64: 1, 128>}, {pipeline_mode = #tpu.pipeline_mode<synchronous>, transform_indices = @transform_5, window_bounds = array<i64: 128, 128>}, {pipeline_mode = #tpu.pipeline_mode<synchronous>, transform_indices = @transform_6, window_bounds = array<i64: 1, 2>}, {transform_indices = @transform_7, window_bounds = array<i64: 8, 2>}]} {
    %c0 = arith.constant 0 : index
    %c0_0 = arith.constant 0 : index
    %0 = vector.load %arg1[%c0, %c0_0] : memref<8x4xf32, #tpu.memory_space<vmem>>, vector<8x4xf32>
    %1 = arith.truncf %0 : vector<8x4xf32> to vector<8x4xbf16>
    %c0_1 = arith.constant 0 : index
    %c0_2 = arith.constant 0 : index
    %2 = vector.load %arg2[%c0_1, %c0_2] : memref<4x128xbf16, #tpu.memory_space<vmem>>, vector<4x128xbf16>
    %cst = arith.constant dense<0.000000e+00> : vector<8x128xf32>
    %3 = tpu.matmul %1, %2, %cst {dimension_numbers = #tpu.dot_dimension_numbers<[1], [0], [0], [1], [0, 0, 1, 1], [], []>} : vector<8x4xbf16>, vector<4x128xbf16>, vector<8x128xf32> -> vector<8x128xf32>
    %c0_3 = arith.constant 0 : index
    %c0_4 = arith.constant 0 : index
    %4 = vector.load %arg3[%c0_3, %c0_4] : memref<1x128xf32, #tpu.memory_space<vmem>>, vector<1x128xf32>
    %5 = vector.broadcast %4 : vector<1x128xf32> to vector<8x128xf32>
    %6 = arith.addf %3, %5 : vector<8x128xf32>
    %cst_5 = arith.constant 0.000000e+00 : f32
    %7 = vector.broadcast %cst_5 : f32 to vector<8x128xf32>
    %8 = arith.maximumf %6, %7 : vector<8x128xf32>
    %9 = arith.truncf %8 : vector<8x128xf32> to vector<8x128xbf16>
    %c0_6 = arith.constant 0 : index
    %c0_7 = arith.constant 0 : index
    %10 = vector.load %arg4[%c0_6, %c0_7] : memref<128x128xbf16, #tpu.memory_space<vmem>>, vector<128x128xbf16>
    %cst_8 = arith.constant dense<0.000000e+00> : vector<8x128xf32>
    %11 = tpu.matmul %9, %10, %cst_8 {dimension_numbers = #tpu.dot_dimension_numbers<[1], [0], [0], [1], [0, 0, 1, 1], [], []>} : vector<8x128xbf16>, vector<128x128xbf16>, vector<8x128xf32> -> vector<8x128xf32>
    %c0_9 = arith.constant 0 : index
    %c0_10 = arith.constant 0 : index
    %12 = vector.load %arg5[%c0_9, %c0_10] : memref<1x128xf32, #tpu.memory_space<vmem>>, vector<1x128xf32>
    %13 = vector.broadcast %12 : vector<1x128xf32> to vector<8x128xf32>
    %14 = arith.addf %11, %13 : vector<8x128xf32>
    %cst_11 = arith.constant 0.000000e+00 : f32
    %15 = vector.broadcast %cst_11 : f32 to vector<8x128xf32>
    %16 = arith.maximumf %14, %15 : vector<8x128xf32>
    %17 = arith.truncf %16 : vector<8x128xf32> to vector<8x128xbf16>
    %c0_12 = arith.constant 0 : index
    %c0_13 = arith.constant 0 : index
    %18 = vector.load %arg6[%c0_12, %c0_13] : memref<128x128xbf16, #tpu.memory_space<vmem>>, vector<128x128xbf16>
    %cst_14 = arith.constant dense<0.000000e+00> : vector<8x128xf32>
    %19 = tpu.matmul %17, %18, %cst_14 {dimension_numbers = #tpu.dot_dimension_numbers<[1], [0], [0], [1], [0, 0, 1, 1], [], []>} : vector<8x128xbf16>, vector<128x128xbf16>, vector<8x128xf32> -> vector<8x128xf32>
    %20 = vector.extract_strided_slice %19 {offsets = [0, 0], sizes = [8, 2], strides = [1, 1]} : vector<8x128xf32> to vector<8x2xf32>
    %c0_15 = arith.constant 0 : index
    %c0_16 = arith.constant 0 : index
    %21 = vector.load %arg7[%c0_15, %c0_16] : memref<1x2xf32, #tpu.memory_space<vmem>>, vector<1x2xf32>
    %22 = vector.broadcast %21 : vector<1x2xf32> to vector<8x2xf32>
    %23 = arith.addf %20, %22 : vector<8x2xf32>
    %c0_17 = arith.constant 0 : index
    %c0_18 = arith.constant 0 : index
    %24 = vector.load %arg8[%c0_17, %c0_18] : memref<8x2xf32, #tpu.memory_space<vmem>>, vector<8x2xf32>
    tpu.vector_store %arg8[%c0_17, %c0_18], %23 {strides = array<i32>} : memref<8x2xf32, #tpu.memory_space<vmem>>, vector<8x2xf32>,
    return
  }
  func.func @transform_0(%arg0: i32) -> (i32, i32) {
    %c0_i32 = arith.constant 0 : i32
    %c0_i32_0 = arith.constant 0 : i32
    return %arg0, %c0_i32 : i32, i32
  }
  func.func @transform_1(%arg0: i32) -> (i32, i32) {
    %c0_i32 = arith.constant 0 : i32
    %c0_i32_0 = arith.constant 0 : i32
    %c0_i32_1 = arith.constant 0 : i32
    return %c0_i32, %c0_i32_0 : i32, i32
  }
  func.func @transform_2(%arg0: i32) -> (i32, i32) {
    %c0_i32 = arith.constant 0 : i32
    %c0_i32_0 = arith.constant 0 : i32
    %c0_i32_1 = arith.constant 0 : i32
    return %c0_i32, %c0_i32_0 : i32, i32
  }
  func.func @transform_3(%arg0: i32) -> (i32, i32) {
    %c0_i32 = arith.constant 0 : i32
    %c0_i32_0 = arith.constant 0 : i32
    %c0_i32_1 = arith.constant 0 : i32
    return %c0_i32, %c0_i32_0 : i32, i32
  }
  func.func @transform_4(%arg0: i32) -> (i32, i32) {
    %c0_i32 = arith.constant 0 : i32
    %c0_i32_0 = arith.constant 0 : i32
    %c0_i32_1 = arith.constant 0 : i32
    return %c0_i32, %c0_i32_0 : i32, i32
  }
  func.func @transform_5(%arg0: i32) -> (i32, i32) {
    %c0_i32 = arith.constant 0 : i32
    %c0_i32_0 = arith.constant 0 : i32
    %c0_i32_1 = arith.constant 0 : i32
    return %c0_i32, %c0_i32_0 : i32, i32
  }
  func.func @transform_6(%arg0: i32) -> (i32, i32) {
    %c0_i32 = arith.constant 0 : i32
    %c0_i32_0 = arith.constant 0 : i32
    %c0_i32_1 = arith.constant 0 : i32
    return %c0_i32, %c0_i32_0 : i32, i32
  }
  func.func @transform_7(%arg0: i32) -> (i32, i32) {
    %c0_i32 = arith.constant 0 : i32
    %c0_i32_0 = arith.constant 0 : i32
    return %arg0, %c0_i32 : i32, i32
  }
}

</mosaic_0001>

<bundles_post_ra>
// kernel: qnetwork_forward.1
= control target key start
LH: loop header
LB: loop body
LE: loop exit
PB: predicated region body
PF: predicated region fallthrough
CT: control target
= control target key end

     0   :  { %vm38_vm0 = vcmask 1041408   ;;  %vm34_vm1 = vcmask 31744   ;;  %vm222_vm2 = vcmask 15360   ;;  %s418_s1 = inlined_call_operand.vmem [shape: bf16[4,128], index: 1, kind: input, shape index: {}]   ;;  %s419_s0 = inlined_call_operand.vmem [shape: f32[8,4], index: 0, kind: input, shape index: {}]   ;;  %s420_s3 = inlined_call_operand.vmem [shape: bf16[128,128], index: 3, kind: input, shape index: {}]   ;;  %s421_s2 = inlined_call_operand.vmem [shape: f32[1,128], index: 2, kind: input, shape index: {}]   ;;  %s422_s4 = inlined_call_operand.vmem [shape: f32[1,128], index: 4, kind: input, shape index: {}]   ;;  %s423_s5 = inlined_call_operand.vmem [shape: bf16[128,128], index: 5, kind: input, shape index: {}]   ;;  %s424_s6 = inlined_call_operand.vmem [shape: f32[1,2], index: 6, kind: input, shape index: {}]   ;;  %s425_s7 = inlined_call_operand.vmem [shape: f32[8,2], index: 7, kind: output, shape index: {}]  }
   0x1   :  { %v29_v0 = vld [vmem:[%s418_s1] sm:$0x3]  ;;  %v300_v2 = vld [vmem:[%s420_s3 + $0x38] sm:$0xff]  ;;  %v299_v5 = vld [vmem:[%s420_s3 + $0x30] sm:$0xff] }
   0x2   :  { %v27_v1 = vld [vmem:[%s419_s0] sm:$0xff]  ;;  %v40_v3 = vsel %vm38_vm0, %v29_v0, 0  ;;  %125 = vmatpush.bf16.msra.mxu1 %v300_v2  ;;  %v298_v6 = vld [vmem:[%s420_s3 + $0x28] sm:$0xff]  ;;  %v296_v8 = vld [vmem:[%s420_s3 + $0x18] sm:$0xff] }
   0x3   :  { %v28_v4 = vpack.c.bf16 %v27_v1, %v27_v1  ;;  %49 = vmatpush.bf16.msra.mxu0 %v40_v3  ;;  %v297_v7 = vld [vmem:[%s420_s3 + $0x20] sm:$0xff]  ;;  %v295_v9 = vld [vmem:[%s420_s3 + $0x10] sm:$0xff]  ;;  %v294_v10 = vld [vmem:[%s420_s3 + $0x8] sm:$0xff] }
   0x4   :  { %v293_v11 = vld [vmem:[%s420_s3] sm:$0xff]  ;;  %v308_v12 = vld [vmem:[%s423_s5 + $0x38] sm:$0xff]  ;;  %v307_v13 = vld [vmem:[%s423_s5 + $0x30] sm:$0xff] }
   0x5   :  { %204 = vmatpush.bf16.msra.mxu2 %v308_v12  ;;  %v306_v14 = vld [vmem:[%s423_s5 + $0x28] sm:$0xff]  ;;  %v305_v15 = vld [vmem:[%s423_s5 + $0x20] sm:$0xff]  ;;  %v304_v16 = vld [vmem:[%s423_s5 + $0x18] sm:$0xff] }
   0x6   :  { %228 = vmatmul.msk.bf16.vlgmr.msra.gmra.mxu0 %vm34_vm1, %v28_v4  ;;  %126 = vmatpush.bf16.msra.mxu1 %v299_v5  ;;  %v303_v17 = vld [vmem:[%s423_s5 + $0x10] sm:$0xff]  ;;  %v309_v18 = vld [vmem:[%s421_s2] ss:$0 sm:$0xff]  ;;  %v302_v24 = vld [vmem:[%s423_s5 + $0x8] sm:$0xff] }
   0x7   :  { %v301_v25 = vld [vmem:[%s423_s5] sm:$0xff] }
   0x8   :  { %v310_v26 = vld [vmem:[%s422_s4] ss:$0 sm:$0xff] }
   0x9   :  { %205 = vmatpush.bf16.msra.mxu2 %v307_v13  ;;  %v311_v32 = vld [vmem:[%s424_s6] ss:$0 sm:$0xff] }
   0xa   :  { %127 = vmatpush.bf16.msra.mxu1 %v298_v6 }
   0xd   :  { %206 = vmatpush.bf16.msra.mxu2 %v306_v14 }
   0xe   :  { %128 = vmatpush.bf16.msra.mxu1 %v297_v7 }
  0x11   :  { %207 = vmatpush.bf16.msra.mxu2 %v305_v15 }
  0x12   :  { %129 = vmatpush.bf16.msra.mxu1 %v296_v8 }
  0x15   :  { %208 = vmatpush.bf16.msra.mxu2 %v304_v16 }
  0x16   :  { %130 = vmatpush.bf16.msra.mxu1 %v295_v9 }
  0x19   :  { %209 = vmatpush.bf16.msra.mxu2 %v303_v17 }
  0x1a   :  { %131 = vmatpush.bf16.msra.mxu1 %v294_v10 }
  0x1d   :  { %210 = vmatpush.bf16.msra.mxu2 %v302_v24 }
  0x1e   :  { %132 = vmatpush.bf16.msra.mxu1 %v293_v11 }
  0x21   :  { %211 = vmatpush.bf16.msra.mxu2 %v301_v25 }
  0x83   :  { %v51_v19 = vpop.f32.mrf.mxu0 }
  0x84   :  { %v52_v20 = vadd.f32 %v309_v18, %v51_v19 }
  0x86   :  { %v55_v21 = vmax.f32 %v52_v20, 0.0 }
  0x88   :  { %v56_v22 = vpack.c.bf16 %v55_v21, %v55_v21 }
  0x8a   :  { %133 = vmatmul.bf16.vlgmr.msra.gmra.mxu1 %v56_v22 }
  0x8b   :  { %v53_v23 = vpop.f32.mrf.mxu0 }
 0x107   :  { %v134_v27 = vpop.f32.mrf.mxu1 }
 0x108   :  { %v135_v28 = vadd.f32 %v310_v26, %v134_v27 }
 0x10a   :  { %v138_v29 = vmax.f32 %v135_v28, 0.0 }
 0x10c   :  { %v139_v30 = vpack.c.bf16 %v138_v29, %v138_v29 }
 0x10e   :  { %212 = vmatmul.bf16.vlgmr.msra.gmra.mxu2 %v139_v30 }
 0x10f   :  { %v136_v31 = vpop.f32.mrf.mxu1 }
 0x191   :  { %v213_v33 = vpop.f32.mrf.mxu2 }
 0x192   :  { %v221_v34 = vadd.f32 %v311_v32, %v213_v33 }
 0x194   :  { %223 = vst.msk [vmem:[%s425_s7] sm:$0xff] %vm222_vm2, %v221_v34 }
 0x199   :  { %v215_v35 = vpop.f32.mrf.mxu2 }

</bundles_post_ra>
